<compile_context>
chip_gen: v7x
topology: tpu7x:2x2x1
jax: 0.10.0
libtpu: 0.0.40
codegen_flags: <defaults>
</compile_context>

<pallas_src>
import functools

import jax
import jax.numpy as jnp
from jax.experimental import pallas as pl
from jax.experimental.pallas import tpu as pltpu


# ----------------------------------------------------------------------------
# norm: x (B,F,N,L) -> y (B,F,N,L), mean (B,F,N,1), stdev (B,F,N,1)
# Grid (B, F); each step handles one (N, L) slab.
# ----------------------------------------------------------------------------
def _mfin_norm_kernel(x_ref, w_ref, b_ref, y_ref, mean_ref, std_ref,
                      *, eps, affine, tanh_est, inv_l):
    x = x_ref[...].astype(jnp.float32)                 # (N, L), f32 compute
    # --- one-pass statistics: a single reduction pass over the slab ---
    s1 = jnp.sum(x, axis=-1, keepdims=True)            # (N, 1)
    s2 = jnp.sum(x * x, axis=-1, keepdims=True)        # (N, 1)
    mean = s1 * inv_l
    var = jnp.maximum(s2 * inv_l - mean * mean, 0.0)   # clamp cancellation
    inv_std = jax.lax.rsqrt(var + eps)                 # tiny (N,1): EUP, cheap
    std = jnp.sqrt(var + eps)                          # tiny (N,1)

    if tanh_est:
        # Fold 0.01 into inv_std and 0.5*(tanh+1)*w + b into per-node
        # scale/offset so the per-element work is: sub, mul, tanh, fma.
        t = jnp.tanh((x - mean) * (inv_std * 0.01))
        if affine:
            w = w_ref[...].astype(jnp.float32)         # (N, 1)
            b = b_ref[...].astype(jnp.float32)         # (N, 1)
            y = t * (0.5 * w) + (0.5 * w + b)
        else:
            y = t * 0.5 + 0.5
    else:
        y = (x - mean) * inv_std
        if affine:
            w = w_ref[...].astype(jnp.float32)
            b = b_ref[...].astype(jnp.float32)
            y = y * w + b

    y_ref[...] = y.astype(y_ref.dtype)
    mean_ref[...] = mean.astype(mean_ref.dtype)        # stats kept in f32
    std_ref[...] = std.astype(std_ref.dtype)


def mfin_norm(x, affine_weight, affine_bias, *, eps=1e-5, affine=True,
              tanh_est=True):
    B, F, N, L = x.shape
    kernel = functools.partial(_mfin_norm_kernel, eps=float(eps),
                               affine=affine, tanh_est=tanh_est,
                               inv_l=1.0 / float(L))
    elems = B * F * N * L
    bytes_acc = int(2 * elems * x.dtype.itemsize
                    + 2 * F * N * affine_weight.dtype.itemsize
                    + 2 * B * F * N * 4)

    y, mean, std = pl.pallas_call(
        kernel,
        out_shape=(
            jax.ShapeDtypeStruct((B, F, N, L), x.dtype),
            jax.ShapeDtypeStruct((B, F, N, 1), jnp.float32),
            jax.ShapeDtypeStruct((B, F, N, 1), jnp.float32),
        ),
        grid=(B, F),
        in_specs=[
            pl.BlockSpec((pl.Squeezed(), pl.Squeezed(), N, L),
                         lambda b, f: (b, f, 0, 0)),
            pl.BlockSpec((pl.Squeezed(), N, 1), lambda b, f: (f, 0, 0)),
            pl.BlockSpec((pl.Squeezed(), N, 1), lambda b, f: (f, 0, 0)),
        ],
        out_specs=(
            pl.BlockSpec((pl.Squeezed(), pl.Squeezed(), N, L),
                         lambda b, f: (b, f, 0, 0)),
            pl.BlockSpec((pl.Squeezed(), pl.Squeezed(), N, 1),
                         lambda b, f: (b, f, 0, 0)),
            pl.BlockSpec((pl.Squeezed(), pl.Squeezed(), N, 1),
                         lambda b, f: (b, f, 0, 0)),
        ),
        compiler_params=pltpu.CompilerParams(
            dimension_semantics=("parallel", "parallel"),
            # Explicit scoped-VMEM budget; per-(b, f) blocks are small, this
            # stays well within v7x's 64 MiB physical VMEM.
            vmem_limit_bytes=32 * 1024 * 1024,
        ),
        cost_estimate=pl.CostEstimate(
            flops=int(8 * elems),
            transcendentals=int(elems),
            bytes_accessed=bytes_acc,
        ),
    )(x, affine_weight, affine_bias)
    return y, mean, std


# ----------------------------------------------------------------------------
# denorm: x (B,N,Lout) with stats/affine from the target feature (index 1).
# Single grid-less invocation (tensor is tiny, whole arrays live in VMEM).
# ----------------------------------------------------------------------------
def _mfin_denorm_kernel(x_ref, w1_ref, b1_ref, mean1_ref, std1_ref, y_ref,
                        *, eps, affine, tanh_est):
    x = x_ref[...].astype(jnp.float32)                  # (B, N, Lout)
    if affine:
        # Reciprocal on the tiny (1, N, 1) tensor, per-element multiply only.
        inv_w = pl.reciprocal(w1_ref[...].astype(jnp.float32) + eps * eps)
        x = (x - b1_ref[...].astype(jnp.float32)) * inv_w
    if tanh_est:
        t = 2.0 * x - 1.0                               # x / 0.5 - 1
        # arctanh(t)/0.01 = 50*(log(1+t) - log(1-t)): two EUP logs, no
        # per-element divide. Same domain as torch.arctanh (+-inf at t=+-1);
        # no clamping, to preserve the reference semantics.
        x = 50.0 * (jnp.log(1.0 + t) - jnp.log(1.0 - t))
        x = (x * std1_ref[...].astype(jnp.float32)
             + mean1_ref[...].astype(jnp.float32))
        x = jnp.round(x * 1e6) * 1e-6                   # torch.round(decimals=6)
    else:
        x = (x * std1_ref[...].astype(jnp.float32)
             + mean1_ref[...].astype(jnp.float32))
    y_ref[...] = x.astype(y_ref.dtype)


def mfin_denorm(x, mean, stdev, affine_weight, affine_bias, *, eps=1e-5,
                affine=True, tanh_est=True):
    B, N, Lout = x.shape
    # Target-feature slices (tiny arrays, sliced once outside the kernel).
    w1 = affine_weight[1].reshape(1, N, 1)
    b1 = affine_bias[1].reshape(1, N, 1)
    mean1 = mean[:, 1]                                  # (B, N, 1) f32
    std1 = stdev[:, 1]                                  # (B, N, 1) f32

    kernel = functools.partial(_mfin_denorm_kernel, eps=float(eps),
                               affine=affine, tanh_est=tanh_est)
    elems = B * N * Lout
    out = pl.pallas_call(
        kernel,
        out_shape=jax.ShapeDtypeStruct((B, N, Lout), x.dtype),
        # No grid: a single step over the whole (tiny) tensor avoids
        # per-step grid overhead; defaults place all operands in VMEM.
        cost_estimate=pl.CostEstimate(
            flops=int(10 * elems),
            transcendentals=int(2 * elems),
            bytes_accessed=int(2 * elems * x.dtype.itemsize
                               + (2 * N + 2 * B * N) * 4),
        ),
    )(x, w1, b1, mean1, std1)
    return out


# ----------------------------------------------------------------------------
# Thin stateful wrapper mirroring the PyTorch module interface.
# ----------------------------------------------------------------------------
class MFIn:
    def __init__(self, num_nodes, num_features, eps=1e-5, affine=True,
                 tanh_est=True, dtype=jnp.float32):
        self.num_features = num_features
        self.N = num_nodes
        self.eps = eps
        self.affine = affine
        self.tanh_est = tanh_est
        # affine params (ones/zeros also used as inert dummies when affine=False)
        self.affine_weight = jnp.ones((num_features, num_nodes, 1), dtype)
        self.affine_bias = jnp.zeros((num_features, num_nodes, 1), dtype)
        self.mean = None
        self.stdev = None

    def __call__(self, x, mode):
        if mode == "norm":
            y, self.mean, self.stdev = mfin_norm(
                x, self.affine_weight, self.affine_bias, eps=self.eps,
                affine=self.affine, tanh_est=self.tanh_est)
            return y
        elif mode == "denorm":
            return mfin_denorm(
                x, self.mean, self.stdev, self.affine_weight,
                self.affine_bias, eps=self.eps, affine=self.affine,
                tanh_est=self.tanh_est)
        else:
            raise NotImplementedError(mode)


if __name__ == "__main__":
    key = jax.random.PRNGKey(0)
    kx, kw, kb = jax.random.split(key, 3)

    B, F, N, L, Lout = 2, 4, 16, 16, 8
    x = jax.random.normal(kx, (B, F, N, L), dtype=jnp.float32)

    m = MFIn(num_nodes=N, num_features=F, eps=1e-5, affine=True, tanh_est=True)
    # non-trivial affine parameters so the test exercises the full math
    m.affine_weight = 1.0 + 0.1 * jax.random.normal(kw, (F, N, 1), jnp.float32)
    m.affine_bias = 0.05 * jax.random.normal(kb, (F, N, 1), jnp.float32)

    # ---------------- norm ----------------
    y = m(x, "norm")
    y = jax.block_until_ready(y)

    mean_ref = jnp.mean(x, axis=3, keepdims=True)
    std_ref = jnp.sqrt(jnp.var(x, axis=3, keepdims=True) + m.eps)
    y_ref = 0.5 * (jnp.tanh(0.01 * ((x - mean_ref) / std_ref)) + 1.0)
    y_ref = y_ref * m.affine_weight + m.affine_bias

    assert y.shape == (B, F, N, L), y.shape
    assert m.mean.shape == (B, F, N, 1), m.mean.shape
    assert m.stdev.shape == (B, F, N, 1), m.stdev.shape
    assert jnp.allclose(y, y_ref, atol=1e-4, rtol=1e-4), "norm mismatch"
    assert jnp.allclose(m.mean, mean_ref, atol=1e-5, rtol=1e-5), "mean mismatch"
    assert jnp.allclose(m.stdev, std_ref, atol=1e-5, rtol=1e-5), "stdev mismatch"

    # ---------------- denorm ----------------
    # A "prediction" in the model's output layout (B, N, Lout): use the target
    # feature channel of the normalised tensor so arctanh stays in-domain.
    pred = y[:, 1, :, :Lout]
    z = m(pred, "denorm")
    z = jax.block_until_ready(z)

    d = pred - m.affine_bias[1]
    d = d / (m.affine_weight[1] + m.eps * m.eps)
    d = d / 0.5 - 1.0
    d = jnp.arctanh(d)
    d = d / 0.01
    d = d * std_ref[:, 1] + mean_ref[:, 1]
    d_ref = jnp.round(d * 1e6) * 1e-6

    assert z.shape == (B, N, Lout), z.shape
    assert jnp.allclose(z, d_ref, atol=1e-4, rtol=1e-4), "denorm mismatch"

    print("KERNEL_OK")
</pallas_src>

<mosaic_0001>
module attributes {stable_mosaic.version = 11 : i64} {
  func.func @_mfin_norm_kernel(%arg0: i32, %arg1: i32, %arg2: memref<1x1x16x16xf32, #tpu.memory_space<vmem>>, %arg3: memref<1x16x1xf32, #tpu.memory_space<vmem>>, %arg4: memref<1x16x1xf32, #tpu.memory_space<vmem>>, %arg5: memref<1x1x16x16xf32, #tpu.memory_space<vmem>>, %arg6: memref<1x1x16x1xf32, #tpu.memory_space<vmem>>, %arg7: memref<1x1x16x1xf32, #tpu.memory_space<vmem>>) attributes {dimension_semantics = [#tpu.dimension_semantics<parallel>, #tpu.dimension_semantics<parallel>], iteration_bounds = array<i64: 2, 4>, scalar_prefetch = 0 : i64, scratch_operands = 0 : i64, tpu.core_type = #tpu.core_type<tc>, window_params = [{transform_indices = @transform_0, window_bounds = array<i64: 1, 1, 16, 16>}, {transform_indices = @transform_1, window_bounds = array<i64: 1, 16, 1>}, {transform_indices = @transform_2, window_bounds = array<i64: 1, 16, 1>}, {transform_indices = @transform_3, window_bounds = array<i64: 1, 1, 16, 16>}, {transform_indices = @transform_4, window_bounds = array<i64: 1, 1, 16, 1>}, {transform_indices = @transform_5, window_bounds = array<i64: 1, 1, 16, 1>}]} {
    %c0 = arith.constant 0 : index
    %c0_0 = arith.constant 0 : index
    %c0_1 = arith.constant 0 : index
    %c0_2 = arith.constant 0 : index
    %0 = vector.load %arg2[%c0, %c0_0, %c0_1, %c0_2] : memref<1x1x16x16xf32, #tpu.memory_space<vmem>>, vector<1x1x16x16xf32>
    %1 = vector.shape_cast %0 : vector<1x1x16x16xf32> to vector<16x16xf32>
    %cst = arith.constant dense<0.000000e+00> : vector<16xf32>
    %2 = vector.multi_reduction <add>, %1, %cst [1] : vector<16x16xf32> to vector<16xf32>
    %3 = vector.shape_cast %2 : vector<16xf32> to vector<16x1xf32>
    %4 = arith.mulf %1, %1 : vector<16x16xf32>
    %cst_3 = arith.constant dense<0.000000e+00> : vector<16xf32>
    %5 = vector.multi_reduction <add>, %4, %cst_3 [1] : vector<16x16xf32> to vector<16xf32>
    %6 = vector.shape_cast %5 : vector<16xf32> to vector<16x1xf32>
    %cst_4 = arith.constant 6.250000e-02 : f32
    %7 = vector.broadcast %cst_4 : f32 to vector<16x1xf32>
    %8 = arith.mulf %3, %7 : vector<16x1xf32>
    %cst_5 = arith.constant 6.250000e-02 : f32
    %9 = vector.broadcast %cst_5 : f32 to vector<16x1xf32>
    %10 = arith.mulf %6, %9 : vector<16x1xf32>
    %11 = arith.mulf %8, %8 : vector<16x1xf32>
    %12 = arith.subf %10, %11 : vector<16x1xf32>
    %cst_6 = arith.constant 0.000000e+00 : f32
    %13 = vector.broadcast %cst_6 : f32 to vector<16x1xf32>
    %14 = arith.maximumf %12, %13 : vector<16x1xf32>
    %cst_7 = arith.constant 9.99999974E-6 : f32
    %15 = vector.broadcast %cst_7 : f32 to vector<16x1xf32>
    %16 = arith.addf %14, %15 : vector<16x1xf32>
    %17 = math.rsqrt %16 : vector<16x1xf32>
    %cst_8 = arith.constant 9.99999974E-6 : f32
    %18 = vector.broadcast %cst_8 : f32 to vector<16x1xf32>
    %19 = arith.addf %14, %18 : vector<16x1xf32>
    %20 = math.sqrt %19 : vector<16x1xf32>
    %21 = vector.broadcast %8 : vector<16x1xf32> to vector<16x16xf32>
    %22 = arith.subf %1, %21 : vector<16x16xf32>
    %cst_9 = arith.constant 0.00999999977 : f32
    %23 = vector.broadcast %cst_9 : f32 to vector<16x1xf32>
    %24 = arith.mulf %17, %23 : vector<16x1xf32>
    %25 = vector.broadcast %24 : vector<16x1xf32> to vector<16x16xf32>
    %26 = arith.mulf %22, %25 : vector<16x16xf32>
    %27 = math.tanh %26 : vector<16x16xf32>
    %c0_10 = arith.constant 0 : index
    %c0_11 = arith.constant 0 : index
    %c0_12 = arith.constant 0 : index
    %28 = vector.load %arg3[%c0_10, %c0_11, %c0_12] : memref<1x16x1xf32, #tpu.memory_space<vmem>>, vector<1x16x1xf32>
    %29 = vector.shape_cast %28 : vector<1x16x1xf32> to vector<16x1xf32>
    %c0_13 = arith.constant 0 : index
    %c0_14 = arith.constant 0 : index
    %c0_15 = arith.constant 0 : index
    %30 = vector.load %arg4[%c0_13, %c0_14, %c0_15] : memref<1x16x1xf32, #tpu.memory_space<vmem>>, vector<1x16x1xf32>
    %31 = vector.shape_cast %30 : vector<1x16x1xf32> to vector<16x1xf32>
    %cst_16 = arith.constant 5.000000e-01 : f32
    %32 = vector.broadcast %cst_16 : f32 to vector<16x1xf32>
    %33 = arith.mulf %32, %29 : vector<16x1xf32>
    %34 = vector.broadcast %33 : vector<16x1xf32> to vector<16x16xf32>
    %35 = arith.mulf %27, %34 : vector<16x16xf32>
    %cst_17 = arith.constant 5.000000e-01 : f32
    %36 = vector.broadcast %cst_17 : f32 to vector<16x1xf32>
    %37 = arith.mulf %36, %29 : vector<16x1xf32>
    %38 = arith.addf %37, %31 : vector<16x1xf32>
    %39 = vector.broadcast %38 : vector<16x1xf32> to vector<16x16xf32>
    %40 = arith.addf %35, %39 : vector<16x16xf32>
    %c0_18 = arith.constant 0 : index
    %c0_19 = arith.constant 0 : index
    %c0_20 = arith.constant 0 : index
    %c0_21 = arith.constant 0 : index
    %41 = vector.load %arg5[%c0_18, %c0_19, %c0_20, %c0_21] : memref<1x1x16x16xf32, #tpu.memory_space<vmem>>, vector<1x1x16x16xf32>
    %42 = vector.shape_cast %41 : vector<1x1x16x16xf32> to vector<16x16xf32>
    %43 = vector.shape_cast %40 : vector<16x16xf32> to vector<1x1x16x16xf32>
    tpu.vector_store %arg5[%c0_18, %c0_19, %c0_20, %c0_21], %43 {strides = array<i32>} : memref<1x1x16x16xf32, #tpu.memory_space<vmem>>, vector<1x1x16x16xf32>,
    %c0_22 = arith.constant 0 : index
    %c0_23 = arith.constant 0 : index
    %c0_24 = arith.constant 0 : index
    %c0_25 = arith.constant 0 : index
    %44 = vector.load %arg6[%c0_22, %c0_23, %c0_24, %c0_25] : memref<1x1x16x1xf32, #tpu.memory_space<vmem>>, vector<1x1x16x1xf32>
    %45 = vector.shape_cast %44 : vector<1x1x16x1xf32> to vector<16x1xf32>
    %46 = vector.shape_cast %8 : vector<16x1xf32> to vector<1x1x16x1xf32>
    tpu.vector_store %arg6[%c0_22, %c0_23, %c0_24, %c0_25], %46 {strides = array<i32>} : memref<1x1x16x1xf32, #tpu.memory_space<vmem>>, vector<1x1x16x1xf32>,
    %c0_26 = arith.constant 0 : index
    %c0_27 = arith.constant 0 : index
    %c0_28 = arith.constant 0 : index
    %c0_29 = arith.constant 0 : index
    %47 = vector.load %arg7[%c0_26, %c0_27, %c0_28, %c0_29] : memref<1x1x16x1xf32, #tpu.memory_space<vmem>>, vector<1x1x16x1xf32>
    %48 = vector.shape_cast %47 : vector<1x1x16x1xf32> to vector<16x1xf32>
    %49 = vector.shape_cast %20 : vector<16x1xf32> to vector<1x1x16x1xf32>
    tpu.vector_store %arg7[%c0_26, %c0_27, %c0_28, %c0_29], %49 {strides = array<i32>} : memref<1x1x16x1xf32, #tpu.memory_space<vmem>>, vector<1x1x16x1xf32>,
    return
  }
  func.func @transform_0(%arg0: i32, %arg1: i32) -> (i32, i32, i32, i32) {
    %c0_i32 = arith.constant 0 : i32
    %c0_i32_0 = arith.constant 0 : i32
    %c0_i32_1 = arith.constant 0 : i32
    return %arg0, %arg1, %c0_i32, %c0_i32_0 : i32, i32, i32, i32
  }
  func.func @transform_1(%arg0: i32, %arg1: i32) -> (i32, i32, i32) {
    %c0_i32 = arith.constant 0 : i32
    %c0_i32_0 = arith.constant 0 : i32
    %c0_i32_1 = arith.constant 0 : i32
    return %arg1, %c0_i32, %c0_i32_0 : i32, i32, i32
  }
  func.func @transform_2(%arg0: i32, %arg1: i32) -> (i32, i32, i32) {
    %c0_i32 = arith.constant 0 : i32
    %c0_i32_0 = arith.constant 0 : i32
    %c0_i32_1 = arith.constant 0 : i32
    return %arg1, %c0_i32, %c0_i32_0 : i32, i32, i32
  }
  func.func @transform_3(%arg0: i32, %arg1: i32) -> (i32, i32, i32, i32) {
    %c0_i32 = arith.constant 0 : i32
    %c0_i32_0 = arith.constant 0 : i32
    %c0_i32_1 = arith.constant 0 : i32
    return %arg0, %arg1, %c0_i32, %c0_i32_0 : i32, i32, i32, i32
  }
  func.func @transform_4(%arg0: i32, %arg1: i32) -> (i32, i32, i32, i32) {
    %c0_i32 = arith.constant 0 : i32
    %c0_i32_0 = arith.constant 0 : i32
    %c0_i32_1 = arith.constant 0 : i32
    return %arg0, %arg1, %c0_i32, %c0_i32_0 : i32, i32, i32, i32
  }
  func.func @transform_5(%arg0: i32, %arg1: i32) -> (i32, i32, i32, i32) {
    %c0_i32 = arith.constant 0 : i32
    %c0_i32_0 = arith.constant 0 : i32
    %c0_i32_1 = arith.constant 0 : i32
    return %arg0, %arg1, %c0_i32, %c0_i32_0 : i32, i32, i32, i32
  }
}

</mosaic_0001>

<bundles_post_ra>
// kernel: tpu_custom_call.1
= control target key start
LH: loop header
LB: loop body
LE: loop exit
PB: predicated region body
PF: predicated region fallthrough
CT: control target
= control target key end

     0   :  { %11 = vsyncpa [#allocation3], 0  ;;  %s1073_s0 = inlined_call_operand.vmem [shape: f32[2,4,16,16], index: 0, kind: input, shape index: {}]   ;;  %s1074_s1 = inlined_call_operand.vmem [shape: f32[4,16,1], index: 1, kind: input, shape index: {}]   ;;  %s1075_s2 = inlined_call_operand.vmem [shape: f32[4,16,1], index: 2, kind: input, shape index: {}]   ;;  %s1076_s3 = inlined_call_operand.hbm [shape: f32[2,4,16,16], index: 3, kind: output, shape index: {0}]   ;;  %s1077_s4 = inlined_call_operand.vmem [shape: f32[2,4,16,1], index: 4, kind: output, shape index: {1}]   ;;  %s1078_s5 = inlined_call_operand.vmem [shape: f32[2,4,16,1], index: 5, kind: output, shape index: {2}]  }
   0x1   :  { %13 = vsyncpa [#allocation3 + $0x1], 0  ;;  %s900_s18 = smov 0   ;;  %s902_s19 = smov 0  }
   0x2   :  { %s904_s20 = smov 0   ;;  %s906_s21 = smov 0  }
   0x3   :  { %s908_s22 = smov 0   ;;  %s910_s23 = smov 0  }
   0x4   :  { %s912_s24 = smov 0   ;;  %s914_s25 = smov 0  }
   0x5 LB: > { %s659_s26 = sadd.s32 4294967295, %s864_s25   ;;  %s660_s27 = sadd.s32 4294967294, %s864_s25   ;;  %s864_s25 = sphi %s914_s25, %s19_s25   ;;  %s860_s24 = sphi %s912_s24, %s1087_s24   ;;  %s856_s23 = sphi %s910_s23, %s1086_s23   ;;  %s852_s22 = sphi %s908_s22, %s1085_s22   ;;  %s848_s21 = sphi %s906_s21, %s1084_s21   ;;  %s844_s20 = sphi %s904_s20, %s1083_s20   ;;  %s840_s19 = sphi %s902_s19, %s1082_s19   ;;  %s836_s18 = sphi %s900_s18, %s1081_s18  }
   0x6   : > { %s28_s28 = sadd.s32 1, %s856_s23  ;;  %s31_s29 = sadd.s32 1, %s860_s24 }
   0x7   : > { %p29_p0 = scmp.ge.s32.totalorder %s28_s28, 4  ;;  %p130_p1 = scmp.ne.s32.totalorder %s844_s20, %s840_s19 }
   0x8   : > { %p131_p2 = scmp.eq.s32.totalorder %s659_s26, 7  ;;  %p136_p5 = scmp.ne.s32.totalorder %s840_s19, %s836_s18 }
   0x9   : > { %s1089_s28 = smov (%p29_p0, %s28_s28), 0  ;;  %s1091_s29 = smov (!%p29_p0, %s31_s29), %s860_s24 }
   0xa   : > { %s116_s30 = ssub.s32 %s856_s23, %s1089_s28  ;;  %p951_p3 = por %p131_p2, %p130_p1 }
   0xb   : > { %p33_p4 = scmp.ge.s32.totalorder %s1091_s29, 2  ;;  %p137_p6 = scmp.eq.s32.totalorder %s660_s27, 7 }
   0xc   : > { %p663_p7 = scmp.ge.s32.totalorder %s864_s25, 1  ;;  %p239_p9 = scmp.lt.s32.totalorder %s864_s25, 9 }
   0xd   : > { %s1093_s29 = smov (%p33_p4, %s1091_s29), 0  ;;  %p960_p8 = por %p137_p6, %p136_p5 }
   0xe   : > { %s115_s8 = ssub.s32 %s860_s24, %s1093_s29  ;;  %s120_s9 = sadd.s32 1, %s844_s20 }
   0xf   : > { %s117_s10 = sor.u32 %s116_s30, %s115_s8  ;;  %p240_p10 = pnand %p663_p7, %p239_p9 }
  0x10   : > { %p118_p11 = scmp.eq.s32.totalorder %s117_s10, 0  ;;  %p299_p12 = scmp.lt.s32.totalorder (!%p240_p10), %s852_s22, 1  ;;  %v866_v0 = vmov (!%p240_p10), 0   ;;  %vm338_vm0 = vcmask (!%p240_p10), 130048   ;;  %vm423_vm1 = vcmask (!%p240_p10), 7168  }
  0x11   : > { %243 = sbr.rel (%p240_p10) target bundleno = 234 (0xea), region = 32  ;;  %p301_p13 = scmp.lt.s32.totalorder (!%p240_p10), %s848_s21, 3  ;;  %761 = vset.pattern.permute.xlu1 (!%p240_p10), %v866_v0  ;;  %760 = vset.pattern.permute.xlu0 (!%p240_p10), %v866_v0 }
  0x12   : > { %s969_s11 = scalar_select %p118_p11, %s844_s20, %s120_s9  }
  0x13   : > { %s679_s10 = sshll.u32 (!%p240_p10), %s848_s21, 1 }
  0x18   : > { %s300_s12 = scalar_select %p299_p12, %s852_s22, 1 }
  0x19   : > { %s302_s13 = scalar_select %p301_p13, %s848_s21, 3 }
  0x1a   : > { %s666_s14 = sshll.u32 %s300_s12, 3 }
  0x1b   : > { %s665_s15 = sshll.u32 %s302_s13, 1  ;;  %s684_s8 = sshll.u32 %s302_s13, 4 }
  0x1c   : > { %s305_s16 = sadd.s32 %s666_s14, %s665_s15  ;;  %s312_s12 = scalar_lea.vmem %s1074_s1, %s684_s8 }
  0x1d   : > { %s975_s17 = sshll.u32 %s305_s16, 3  ;;  %v390_v9 = vld [vmem:[%s312_s12 + $0x8] sm:$0xff]  ;;  %v389_v10 = vld [vmem:[%s312_s12] sm:$0xff]  ;;  %s317_s16 = scalar_lea.vmem %s1075_s2, %s684_s8 }
  0x1e   : > { %s307_s30 = scalar_lea.vmem %s1073_s0, %s975_s17  ;;  %v394_v11 = vmul.f32 0.5, %v390_v9  ;;  %v393_v12 = vmul.f32 0.5, %v389_v10  ;;  %v391_v13 = vld [vmem:[%s317_s16] sm:$0xff]  ;;  %v392_v15 = vld [vmem:[%s317_s16 + $0x8] sm:$0xff]  ;;  %s326_s27 = scalar_lea.vmem %s1077_s4, %s975_s17 }
  0x1f   : > { %v336_v1 = vld [vmem:[%s307_s30] sm:$0xff]  ;;  %v981_v2 = vld [vmem:[%s307_s30 + $0x8] sm:$0xff]  ;;  %s335_s9 = scalar_lea.vmem %s1078_s5, %s975_s17  ;;  %s274_s17 = sand.u32 1, %s840_s19  }
  0x20   : > { %v339_v3 = vsel %vm338_vm0, %v336_v1, 0.0  ;;  %v345_v4 = vmul.f32 %v336_v1, %v336_v1  ;;  %v346_v5 = vmul.f32 %v981_v2, %v981_v2  ;;  %v342_v7 = vsel %vm338_vm0, %v981_v2, 0.0  ;;  %s680_s12 = sshll.u32 %s852_s22, 3  ;;  %s664_s14 = sshll.u32 %s274_s17, 4 }
  0x21   : > { %340 = vadd.xlane.f32.xlu0 %v339_v3  ;;  %v407_v14 = vadd.f32 %v393_v12, %v391_v13  ;;  %v408_v16 = vadd.f32 %v394_v11, %v392_v15  ;;  %s459_s15 = sadd.s32 %s680_s12, %s679_s10  ;;  %s276_s16 = scalar_lea.vmem [#allocation2], %s664_s14 }
  0x22   : > { %v347_v6 = vsel %vm338_vm0, %v345_v4, 0.0  ;;  %v350_v8 = vsel %vm338_vm0, %v346_v5, 0.0  ;;  %s462_s13 = sshll.u32 %s276_s16, 4  ;;  %s681_s26 = sshll.u32 %s459_s15, 7  ;;  %s1013_s13 = int_to_ptr.vmem [resolvable:$true] %s462_s13 }
  0x23   : > { %348 = vadd.xlane.f32.xlu1 %v347_v6  ;;  %s1018_s22 = scalar_lea.hbm %s1076_s3, %s681_s26  ;;  %s1021_s30 = scalar_lea.sflag [#allocation3], %s274_s17 }
  0x24   : > { %s770_s8 = scalar_lea.vmem %s1013_s13, 256 }
  0x25   : > { %343 = vadd.xlane.f32.xlu0 %v342_v7  ;;  %p771_p0 = scmp.ne.s32.totalorder %s1013_s13, %s770_s8 }
  0x27   : > { %351 = vadd.xlane.f32.xlu1 %v350_v8  ;;  %p772_p1 = pnand %p771_p0, %p951_p3 }
  0x29   : > { %p773_p2 = pneg %p772_p1 }
  0x38   : > { %402 = vperm.xlu1 %761, %v394_v11  }
  0x3b   : > { %397 = vperm.xlu0 %760, %v393_v12  }
  0x3c   : > { %411 = vperm.xlu1 %761, %v407_v14  }
  0x40   : > { %416 = vperm.xlu1 %761, %v408_v16  }
  0xae   : > { %v341_v17 = vpop.xlane.xlu0 %340 }
  0xaf   : > { %v353_v18 = vmul.f32 0.0625, %v341_v17 }
  0xb0   : > { %v349_v19 = vpop.xlane.xlu1 %348 }
  0xb1   : > { %424 = vst.msk [vmem:[%s326_s27] sm:$0xff] %vm423_vm1, %v353_v18  ;;  %v355_v20 = vmul.f32 0.0625, %v349_v19  ;;  %v357_v21 = vmul.f32 %v353_v18, %v353_v18  ;;  %v381_v34 = vsub.f32 %v336_v1, %v353_v18 }
  0xb2   : > { %v344_v22 = vpop.xlane.xlu0 %343 }
  0xb3   : > { %v359_v23 = vsub.f32 %v355_v20, %v357_v21  ;;  %v354_v24 = vmul.f32 0.0625, %v344_v22 }
  0xb4   : > { %v352_v25 = vpop.xlane.xlu1 %351 }
  0xb5   : > { %v361_v26 = vmax.f32 %v359_v23, 0.0  ;;  %425 = vst.msk [vmem:[%s326_s27 + $0x8] sm:$0xff] %vm423_vm1, %v354_v24  ;;  %v356_v27 = vmul.f32 0.0625, %v352_v25  ;;  %v358_v28 = vmul.f32 %v354_v24, %v354_v24  ;;  %v382_v42 = vsub.f32 %v981_v2, %v354_v24 }
  0xb7   : > { %v363_v29 = vadd.f32 1e-05, %v361_v26  ;;  %v360_v30 = vsub.f32 %v356_v27, %v358_v28 }
  0xb8   : > { %v403_v49 = vpop.permute.xlu1 %402 }
  0xb9   : > { %762 = vrsqrt.f32 %v363_v29  ;;  %v362_v31 = vmax.f32 %v360_v30, 0.0  ;;  %vm369_vm2 = vcmp.eq.f32.partialorder %v363_v29, inf  ;;  %v372_v37 = vand.u32 2147483648, %v363_v29 }
  0xba   : > { %vm371_vm3 = vcmp.eq.f32.partialorder %v363_v29, 0.0  ;;  %v398_v50 = vpop.permute.xlu0 %397 }
  0xbb   : > { %v364_v32 = vadd.f32 1e-05, %v362_v31 }
  0xbc   : > { %v412_v52 = vpop.permute.xlu1 %411 }
  0xbd   : > { %764 = vrsqrt.f32 %v364_v32  ;;  %vm376_vm4 = vcmp.eq.f32.partialorder %v364_v32, inf  ;;  %v379_v45 = vand.u32 2147483648, %v364_v32  ;;  %vm378_vm5 = vcmp.eq.f32.partialorder %v364_v32, 0.0 }
  0xc0   : > { %v417_v57 = vpop.permute.xlu1 %416 }
  0xc3   : > { %v763_v33 = vpop.eup %762 }
  0xc4   : > { %v368_v35 = vmul.f32 %v763_v33, %v363_v29  ;;  %v383_v36 = vmul.f32 0.01, %v763_v33 }
  0xc6   : > { %v370_v38 = vsel %vm369_vm2, %v363_v29, %v368_v35  ;;  %v385_v39 = vmul.f32 %v383_v36, %v381_v34 }
  0xc7   : > { %v373_v40 = vsel %vm371_vm3, %v372_v37, %v370_v38  ;;  %v765_v41 = vpop.eup %764 }
  0xc8   : > { %426 = vst.msk [vmem:[%s335_s9] sm:$0xff] %vm423_vm1, %v373_v40  ;;  %766 = vtanh.f32 %v385_v39  ;;  %v375_v43 = vmul.f32 %v765_v41, %v364_v32  ;;  %v384_v44 = vmul.f32 0.01, %v765_v41 }
  0xca   : > { %v377_v46 = vsel %vm376_vm4, %v364_v32, %v375_v43  ;;  %v386_v47 = vmul.f32 %v384_v44, %v382_v42 }
  0xcb   : > { %v380_v48 = vsel %vm378_vm5, %v379_v45, %v377_v46 }
  0xcc   : > { %427 = vst.msk [vmem:[%s335_s9 + $0x8] sm:$0xff] %vm423_vm1, %v380_v48  ;;  %768 = vtanh.f32 %v386_v47  ;;  %s867_s9 = smov [#allocation2]  }
  0xcd   : > { %s774_s10 = sshll.u32 %s867_s9, 4  ;;  %s775_s10 = int_to_ptr.vmem [resolvable:$false] %s774_s10 }
  0xce   : > { %s776_s12 = scalar_lea.vmem %s775_s10, 512  ;;  %p777_p4 = scmp.lt.s32.totalorder %s1013_s13, %s775_s10 }
  0xcf   : > { %p778_p5 = scmp.lt.s32.totalorder %s776_s12, %s770_s8 }
  0xd1   : > { %p779_p6 = por %p778_p5, %p777_p4 }
  0xd2   : > { %v767_v51 = vpop.eup %766 }
  0xd3   : > { %v405_v53 = vmul.f32 %v767_v51, %v398_v50  ;;  %p780_p7 = pnand %p779_p6, %p773_p2 }
  0xd5   : > { %v419_v54 = vadd.f32 %v412_v52, %v405_v53 }
  0xd6   : > { %v769_v55 = vpop.eup %768 }
  0xd7   : > { %421 = vst.msk [vmem:[%s276_s16] sm:$0xff] %vm338_vm0, %v419_v54  ;;  %v406_v56 = vmul.f32 %v769_v55, %v403_v49 }
  0xd9   : > { %v420_v58 = vadd.f32 %v417_v57, %v406_v56 }
  0xdb   : > { %422 = vst.msk [vmem:[%s276_s16 + $0x8] sm:$0xff] %vm338_vm0, %v420_v58 }
  0xdc   : > { %783 = shalt.err (!%p780_p7)
}
  0xdd   : > { %s784_s17 = scalar_lea.hbm %s1018_s22, 256  ;;  %s788_s16 = scalar_lea.hbm %s1076_s3, 2048 }
  0xde   : > { %p785_p9 = scmp.ne.s32.totalorder %s1018_s22, %s784_s17  ;;  %p789_p12 = scmp.lt.u32.totalorder %s1018_s22, %s1076_s3 }
  0xdf   : > { %p790_p13 = scmp.lt.u32.totalorder %s788_s16, %s784_s17  ;;  %p792_p1 = scmp.lt.u32.totalorder %s784_s17, %s1018_s22 }
  0xe0   : > { %p786_p10 = pnand %p785_p9, %p951_p3 }
  0xe1   : > { %p791_p0 = por %p790_p13, %p789_p12 }
  0xe2   : > { %p787_p11 = pneg %p786_p10 }
  0xe3   : > { %p793_p2 = por %p792_p1, %p791_p0 }
  0xe5   : > { %p794_p4 = pnand %p793_p2, %p787_p11 }
  0xe7   : > { %797 = shalt.err (!%p794_p4)
}
  0xe8   : > { %s868_s21 = smov 128   ;;  %s869_s8 = smov 8  }
  0xe9   : > { %686 = dma.vmem_to_hbm [thread:$0]  (%p951_p3), %s1013_s13, 256, %s1018_s22, %s1021_s30, %s868_s21, %s868_s21, %s869_s8  }
  0xea PF: > { %p692_p5 = scmp.ge.s32.totalorder %s864_s25, 2  ;;  %s483_s9 = sand.u32 1, %s836_s18  }
  0xeb   : > { %s484_s10 = scalar_lea.sflag [#allocation3], %s483_s9 }
  0xec   : > { %p689_p6 = pnand %p692_p5, %p960_p8 }
  0xee   : > { %831 = dma.done.wait (!%p689_p6), %s484_s10, 256  }
  0xef   : > { %833 = vsyncadd (!%p689_p6), %s484_s10, 4294967040  ;;  %s19_s25 = sadd.s32 1, %s864_s25   ;;  %s1081_s18 = smov %s840_s19 }
  0xf0   : > { %p16_p7 = scmp.ge.s32.totalorder %s19_s25, 10   ;;  %s1082_s19 = smov %s844_s20 }
  0xf1   : > { %s1083_s20 = smov %s969_s11  ;;  %s1084_s21 = smov %s856_s23 }
  0xf2   : > { %s1085_s22 = smov %s860_s24  ;;  %s1086_s23 = smov %s1089_s28 }
  0xf3   : > { %s1087_s24 = smov %s1093_s29  ;;  %18 = sbr.rel (!%p16_p7) target bundleno = 5 (0x5), region = 97 }
  0xfa   :  { %513 = vsyncpa [#allocation3], 1 }
  0xfb   :  { %515 = vsyncpa [#allocation3 + $0x1], 1 }

</bundles_post_ra>
